<compile_context>
chip_gen: v7x
topology: tpu7x:2x2x1
jax: 0.10.0
libtpu: 0.0.40
codegen_flags: <defaults>
</compile_context>

<pallas_src>
import math

import jax
import jax.numpy as jnp
from jax.experimental import pallas as pl
from jax.experimental.pallas import tpu as pltpu


# ----------------------------------------------------------------------------
# Diffusion schedule buffers (cosine_beta schedule, as in __init__)
# ----------------------------------------------------------------------------
def cosine_beta_schedule(timesteps: int, s: float = 0.008) -> jnp.ndarray:
    # NOTE: PyTorch reference computes this in float64; without jax_enable_x64
    # we compute in float32 (deviation is well below the asserted tolerance).
    steps = timesteps + 1
    t = jnp.linspace(0.0, float(timesteps), steps, dtype=jnp.float32) / timesteps
    alphas_cumprod = jnp.cos((t + s) / (1.0 + s) * math.pi * 0.5) ** 2
    alphas_cumprod = alphas_cumprod / alphas_cumprod[0]
    betas = 1.0 - (alphas_cumprod[1:] / alphas_cumprod[:-1])
    return jnp.clip(betas, 0.0, 0.999).astype(jnp.float32)


def make_diffusion_buffers(timesteps: int, p2_gamma: float = 0.0, p2_k: float = 1.0):
    betas = cosine_beta_schedule(timesteps)
    alphas = 1.0 - betas
    alphas_cumprod = jnp.cumprod(alphas, axis=0)
    sqrt_alphas_cumprod = jnp.sqrt(alphas_cumprod)
    sqrt_one_minus_alphas_cumprod = jnp.sqrt(1.0 - alphas_cumprod)
    p2_loss_weight = (p2_k + alphas_cumprod / (1.0 - alphas_cumprod)) ** (-p2_gamma)
    return dict(
        betas=betas,
        alphas_cumprod=alphas_cumprod,
        sqrt_alphas_cumprod=sqrt_alphas_cumprod.astype(jnp.float32),
        sqrt_one_minus_alphas_cumprod=sqrt_one_minus_alphas_cumprod.astype(jnp.float32),
        p2_loss_weight=p2_loss_weight.astype(jnp.float32),
    )


# ----------------------------------------------------------------------------
# Pallas kernel: grid = (batch, lane-tile of N); (B, C, N) indexed in place
# ----------------------------------------------------------------------------
def p_losses_kernel(coeffs_ref,               # SMEM: (3, B) f32 — sa / sb / p2 per batch
                    x0_ref, noise_ref,        # VMEM: (C, TN) tiles of (B, C, N)
                    w_ref, bias_ref,          # VMEM (whole array): (C, C), (C, 1)
                    out_ref):                 # VMEM: (1, 128) folded weighted-L1 partial
    b = pl.program_id(0)
    sa = coeffs_ref[0, b]                     # scalar SMEM loads, splat by the VPU
    sb = coeffs_ref[1, b]
    p2w = coeffs_ref[2, b]

    x0 = x0_ref[...]                          # (C, TN)
    noise = noise_ref[...]                    # (C, TN)

    # q_sample: forward diffusion — two scalar-splat FMAs over the tile.
    x_t = sa * x0 + sb * noise

    C, TN = x0.shape
    w = w_ref[...]                            # (C, C)
    if C < 128:
        # Tiny channel count: unrolled VPU FMAs; an (C,C)@(C,TN) matmul would
        # use <1% of the MXU and add push/pop latency to the critical path.
        mix = w[:, 0:1] * x_t[0:1, :]
        for d in range(1, C):
            mix = mix + w[:, d:d + 1] * x_t[d:d + 1, :]
    else:
        # Realistic channel widths: one batched MXU matmul over the tile.
        mix = jnp.dot(w, x_t, preferred_element_type=jnp.float32)
    model_out = mix + bias_ref[...]           # (C, 1) broadcast over lanes

    # objective == 'pred_noise' -> target is the noise; L1 partials.
    absdiff = jnp.abs(model_out - noise)                  # (C, TN)
    per_col = jnp.sum(absdiff, axis=0, keepdims=True)     # (1, TN) sublane reduce

    # Fold lane groups to a single lane-dense (1, 128) partial with static
    # aligned slices (no relayout), p2 weighting fused on the tiny result.
    folded = per_col[:, 0:128]
    for g in range(1, TN // 128):
        folded = folded + per_col[:, g * 128:(g + 1) * 128]
    out_ref[...] = folded * p2w


def _pick_tile_n(N: int, C: int, tile_n: int,
                 vmem_budget_bytes: int = 8 * 1024 * 1024) -> int:
    """Largest multiple of 128 dividing N, <= tile_n, fitting the VMEM budget."""
    assert N % 128 == 0, "seq_length must be a multiple of 128"
    # double-buffered x0 + noise f32 blocks must fit the scoped-VMEM budget
    cap = max(128, (vmem_budget_bytes // (2 * 2 * C * 4)) // 128 * 128)
    tn_max = max(128, min(N, tile_n, cap))
    best = 128
    for cand in range(128, tn_max + 1, 128):
        if N % cand == 0:
            best = cand
    return best


def gaussian_diffusion_forward(img, t, noise, buffers, w, bias, *, tile_n=32768):
    """img: (B, C, N) f32, t: (B,) int32, noise: (B, C, N) f32 -> scalar loss."""
    B, C, N = img.shape

    # gather per-batch schedule coefficients (extract(...) in the reference):
    # tiny (3, B) table, lives in SMEM inside the kernel — no broadcast rows.
    sa = buffers["sqrt_alphas_cumprod"][t]               # (B,)
    sb = buffers["sqrt_one_minus_alphas_cumprod"][t]     # (B,)
    p2 = buffers["p2_loss_weight"][t]                    # (B,)
    coeffs = jnp.stack([sa, sb, p2], axis=0)             # (3, B)

    tn = _pick_tile_n(N, C, tile_n)
    NI = N // tn
    grid = (B, NI)

    smem = pltpu.MemorySpace.SMEM
    vmem = pltpu.MemorySpace.VMEM

    partials = pl.pallas_call(
        p_losses_kernel,
        out_shape=jax.ShapeDtypeStruct((1, B * NI * 128), jnp.float32),
        grid=grid,
        in_specs=[
            pl.BlockSpec(memory_space=smem),                        # coeffs (3, B)
            pl.BlockSpec((None, C, tn), lambda b, i: (b, 0, i)),    # x0    (B, C, N)
            pl.BlockSpec((None, C, tn), lambda b, i: (b, 0, i)),    # noise (B, C, N)
            pl.BlockSpec(memory_space=vmem),                        # W  — whole array
            pl.BlockSpec(memory_space=vmem),                        # bias — whole array
        ],
        out_specs=pl.BlockSpec((1, 128), lambda b, i: (0, b * NI + i)),
        compiler_params=pltpu.CompilerParams(
            # every step writes a distinct output block -> both axes can be
            # sharded across v7x's two TensorCores without a write hazard.
            dimension_semantics=("parallel", "parallel")),
    )(coeffs, img, noise, w, bias)

    # loss = mean_b( p2_b * mean_{c,n} |diff| ) = sum(weighted partials) / (B*C*N)
    return jnp.sum(partials) / jnp.float32(B * C * N)


# ----------------------------------------------------------------------------
# Pure-JAX reference for sanity checking
# ----------------------------------------------------------------------------
def reference_forward(img, t, noise, buffers, w, bias):
    sa = buffers["sqrt_alphas_cumprod"][t][:, None, None]
    sb = buffers["sqrt_one_minus_alphas_cumprod"][t][:, None, None]
    p2 = buffers["p2_loss_weight"][t]
    x_t = sa * img + sb * noise
    model_out = jnp.einsum("cd,bdn->bcn", w, x_t,
                           preferred_element_type=jnp.float32) + bias[None, :, :]
    l1 = jnp.mean(jnp.abs(model_out - noise), axis=(1, 2))
    return jnp.mean(l1 * p2)


# ----------------------------------------------------------------------------
if __name__ == "__main__":
    B, C, N = 4, 8, 128          # batch, channels, seq_length
    T = 1000                     # timesteps

    buffers = make_diffusion_buffers(T)

    key = jax.random.PRNGKey(0)
    k_img, k_t, k_noise = jax.random.split(key, 3)

    img = jax.random.normal(k_img, (B, C, N), dtype=jnp.float32)
    t = jax.random.randint(k_t, (B,), 0, T, dtype=jnp.int32)
    noise = jax.random.normal(k_noise, (B, C, N), dtype=jnp.float32)

    # deterministic synthetic denoiser parameters
    w = (jnp.arange(C * C, dtype=jnp.float32).reshape(C, C) / (C * C) - 0.5) * 0.2
    bias = jnp.linspace(-0.05, 0.05, C, dtype=jnp.float32).reshape(C, 1)

    fwd = jax.jit(lambda *a: gaussian_diffusion_forward(*a))
    loss = fwd(img, t, noise, buffers, w, bias)
    loss = jax.block_until_ready(loss)

    ref = reference_forward(img, t, noise, buffers, w, bias)
    assert jnp.allclose(loss, ref, rtol=1e-4, atol=1e-5), (loss, ref)

    print("KERNEL_OK")
</pallas_src>

<mosaic_0001>
module attributes {stable_mosaic.version = 11 : i64} {
  func.func @p_losses_kernel(%arg0: i32, %arg1: i32, %arg2: memref<3x4xf32, #tpu.memory_space<smem>>, %arg3: memref<1x8x128xf32, #tpu.memory_space<vmem>>, %arg4: memref<1x8x128xf32, #tpu.memory_space<vmem>>, %arg5: memref<8x8xf32, #tpu.memory_space<vmem>>, %arg6: memref<8x1xf32, #tpu.memory_space<vmem>>, %arg7: memref<1x128xf32, #tpu.memory_space<vmem>>) attributes {dimension_semantics = [#tpu.dimension_semantics<parallel>, #tpu.dimension_semantics<parallel>], iteration_bounds = array<i64: 4, 1>, scalar_prefetch = 0 : i64, scratch_operands = 0 : i64, tpu.core_type = #tpu.core_type<tc>, window_params = [{transform_indices = @transform_0, window_bounds = array<i64: 3, 4>}, {transform_indices = @transform_1, window_bounds = array<i64: 1, 8, 128>}, {transform_indices = @transform_2, window_bounds = array<i64: 1, 8, 128>}, {pipeline_mode = #tpu.pipeline_mode<synchronous>, transform_indices = @transform_3, window_bounds = array<i64: 8, 8>}, {pipeline_mode = #tpu.pipeline_mode<synchronous>, transform_indices = @transform_4, window_bounds = array<i64: 8, 1>}, {transform_indices = @transform_5, window_bounds = array<i64: 1, 128>}]} {
    %c0 = arith.constant 0 : index
    %0 = arith.index_cast %arg0 : i32 to index
    %1 = memref.load %arg2[%c0, %0] : memref<3x4xf32, #tpu.memory_space<smem>>
    %c1 = arith.constant 1 : index
    %2 = arith.index_cast %arg0 : i32 to index
    %3 = memref.load %arg2[%c1, %2] : memref<3x4xf32, #tpu.memory_space<smem>>
    %c2 = arith.constant 2 : index
    %4 = arith.index_cast %arg0 : i32 to index
    %5 = memref.load %arg2[%c2, %4] : memref<3x4xf32, #tpu.memory_space<smem>>
    %c0_0 = arith.constant 0 : index
    %c0_1 = arith.constant 0 : index
    %c0_2 = arith.constant 0 : index
    %6 = vector.load %arg3[%c0_0, %c0_1, %c0_2] : memref<1x8x128xf32, #tpu.memory_space<vmem>>, vector<1x8x128xf32>
    %7 = vector.shape_cast %6 : vector<1x8x128xf32> to vector<8x128xf32>
    %c0_3 = arith.constant 0 : index
    %c0_4 = arith.constant 0 : index
    %c0_5 = arith.constant 0 : index
    %8 = vector.load %arg4[%c0_3, %c0_4, %c0_5] : memref<1x8x128xf32, #tpu.memory_space<vmem>>, vector<1x8x128xf32>
    %9 = vector.shape_cast %8 : vector<1x8x128xf32> to vector<8x128xf32>
    %10 = vector.broadcast %1 : f32 to vector<8x128xf32>
    %11 = arith.mulf %10, %7 : vector<8x128xf32>
    %12 = vector.broadcast %3 : f32 to vector<8x128xf32>
    %13 = arith.mulf %12, %9 : vector<8x128xf32>
    %14 = arith.addf %11, %13 : vector<8x128xf32>
    %c0_6 = arith.constant 0 : index
    %c0_7 = arith.constant 0 : index
    %15 = vector.load %arg5[%c0_6, %c0_7] : memref<8x8xf32, #tpu.memory_space<vmem>>, vector<8x8xf32>
    %16 = vector.extract_strided_slice %15 {offsets = [0, 0], sizes = [8, 1], strides = [1, 1]} : vector<8x8xf32> to vector<8x1xf32>
    %17 = vector.extract_strided_slice %14 {offsets = [0, 0], sizes = [1, 128], strides = [1, 1]} : vector<8x128xf32> to vector<1x128xf32>
    %18 = vector.broadcast %16 : vector<8x1xf32> to vector<8x128xf32>
    %19 = vector.broadcast %17 : vector<1x128xf32> to vector<8x128xf32>
    %20 = arith.mulf %18, %19 : vector<8x128xf32>
    %21 = vector.extract_strided_slice %15 {offsets = [0, 1], sizes = [8, 1], strides = [1, 1]} : vector<8x8xf32> to vector<8x1xf32>
    %22 = vector.extract_strided_slice %14 {offsets = [1, 0], sizes = [1, 128], strides = [1, 1]} : vector<8x128xf32> to vector<1x128xf32>
    %23 = vector.broadcast %21 : vector<8x1xf32> to vector<8x128xf32>
    %24 = vector.broadcast %22 : vector<1x128xf32> to vector<8x128xf32>
    %25 = arith.mulf %23, %24 : vector<8x128xf32>
    %26 = arith.addf %20, %25 : vector<8x128xf32>
    %27 = vector.extract_strided_slice %15 {offsets = [0, 2], sizes = [8, 1], strides = [1, 1]} : vector<8x8xf32> to vector<8x1xf32>
    %28 = vector.extract_strided_slice %14 {offsets = [2, 0], sizes = [1, 128], strides = [1, 1]} : vector<8x128xf32> to vector<1x128xf32>
    %29 = vector.broadcast %27 : vector<8x1xf32> to vector<8x128xf32>
    %30 = vector.broadcast %28 : vector<1x128xf32> to vector<8x128xf32>
    %31 = arith.mulf %29, %30 : vector<8x128xf32>
    %32 = arith.addf %26, %31 : vector<8x128xf32>
    %33 = vector.extract_strided_slice %15 {offsets = [0, 3], sizes = [8, 1], strides = [1, 1]} : vector<8x8xf32> to vector<8x1xf32>
    %34 = vector.extract_strided_slice %14 {offsets = [3, 0], sizes = [1, 128], strides = [1, 1]} : vector<8x128xf32> to vector<1x128xf32>
    %35 = vector.broadcast %33 : vector<8x1xf32> to vector<8x128xf32>
    %36 = vector.broadcast %34 : vector<1x128xf32> to vector<8x128xf32>
    %37 = arith.mulf %35, %36 : vector<8x128xf32>
    %38 = arith.addf %32, %37 : vector<8x128xf32>
    %39 = vector.extract_strided_slice %15 {offsets = [0, 4], sizes = [8, 1], strides = [1, 1]} : vector<8x8xf32> to vector<8x1xf32>
    %40 = vector.extract_strided_slice %14 {offsets = [4, 0], sizes = [1, 128], strides = [1, 1]} : vector<8x128xf32> to vector<1x128xf32>
    %41 = vector.broadcast %39 : vector<8x1xf32> to vector<8x128xf32>
    %42 = vector.broadcast %40 : vector<1x128xf32> to vector<8x128xf32>
    %43 = arith.mulf %41, %42 : vector<8x128xf32>
    %44 = arith.addf %38, %43 : vector<8x128xf32>
    %45 = vector.extract_strided_slice %15 {offsets = [0, 5], sizes = [8, 1], strides = [1, 1]} : vector<8x8xf32> to vector<8x1xf32>
    %46 = vector.extract_strided_slice %14 {offsets = [5, 0], sizes = [1, 128], strides = [1, 1]} : vector<8x128xf32> to vector<1x128xf32>
    %47 = vector.broadcast %45 : vector<8x1xf32> to vector<8x128xf32>
    %48 = vector.broadcast %46 : vector<1x128xf32> to vector<8x128xf32>
    %49 = arith.mulf %47, %48 : vector<8x128xf32>
    %50 = arith.addf %44, %49 : vector<8x128xf32>
    %51 = vector.extract_strided_slice %15 {offsets = [0, 6], sizes = [8, 1], strides = [1, 1]} : vector<8x8xf32> to vector<8x1xf32>
    %52 = vector.extract_strided_slice %14 {offsets = [6, 0], sizes = [1, 128], strides = [1, 1]} : vector<8x128xf32> to vector<1x128xf32>
    %53 = vector.broadcast %51 : vector<8x1xf32> to vector<8x128xf32>
    %54 = vector.broadcast %52 : vector<1x128xf32> to vector<8x128xf32>
    %55 = arith.mulf %53, %54 : vector<8x128xf32>
    %56 = arith.addf %50, %55 : vector<8x128xf32>
    %57 = vector.extract_strided_slice %15 {offsets = [0, 7], sizes = [8, 1], strides = [1, 1]} : vector<8x8xf32> to vector<8x1xf32>
    %58 = vector.extract_strided_slice %14 {offsets = [7, 0], sizes = [1, 128], strides = [1, 1]} : vector<8x128xf32> to vector<1x128xf32>
    %59 = vector.broadcast %57 : vector<8x1xf32> to vector<8x128xf32>
    %60 = vector.broadcast %58 : vector<1x128xf32> to vector<8x128xf32>
    %61 = arith.mulf %59, %60 : vector<8x128xf32>
    %62 = arith.addf %56, %61 : vector<8x128xf32>
    %c0_8 = arith.constant 0 : index
    %c0_9 = arith.constant 0 : index
    %63 = vector.load %arg6[%c0_8, %c0_9] : memref<8x1xf32, #tpu.memory_space<vmem>>, vector<8x1xf32>
    %64 = vector.broadcast %63 : vector<8x1xf32> to vector<8x128xf32>
    %65 = arith.addf %62, %64 : vector<8x128xf32>
    %66 = arith.subf %65, %9 : vector<8x128xf32>
    %67 = math.absf %66 : vector<8x128xf32>
    %cst = arith.constant dense<0.000000e+00> : vector<128xf32>
    %68 = vector.multi_reduction <add>, %67, %cst [0] : vector<8x128xf32> to vector<128xf32>
    %69 = vector.shape_cast %68 : vector<128xf32> to vector<1x128xf32>
    %70 = vector.broadcast %5 : f32 to vector<1x128xf32>
    %71 = arith.mulf %69, %70 : vector<1x128xf32>
    %c0_10 = arith.constant 0 : index
    %c0_11 = arith.constant 0 : index
    %72 = vector.load %arg7[%c0_10, %c0_11] : memref<1x128xf32, #tpu.memory_space<vmem>>, vector<1x128xf32>
    tpu.vector_store %arg7[%c0_10, %c0_11], %71 {strides = array<i32>} : memref<1x128xf32, #tpu.memory_space<vmem>>, vector<1x128xf32>,
    return
  }
  func.func @transform_0(%arg0: i32, %arg1: i32) -> (i32, i32) {
    %c0_i32 = arith.constant 0 : i32
    %c0_i32_0 = arith.constant 0 : i32
    %c0_i32_1 = arith.constant 0 : i32
    return %c0_i32, %c0_i32_0 : i32, i32
  }
  func.func @transform_1(%arg0: i32, %arg1: i32) -> (i32, i32, i32) {
    %c0_i32 = arith.constant 0 : i32
    %c0_i32_0 = arith.constant 0 : i32
    return %arg0, %c0_i32, %arg1 : i32, i32, i32
  }
  func.func @transform_2(%arg0: i32, %arg1: i32) -> (i32, i32, i32) {
    %c0_i32 = arith.constant 0 : i32
    %c0_i32_0 = arith.constant 0 : i32
    return %arg0, %c0_i32, %arg1 : i32, i32, i32
  }
  func.func @transform_3(%arg0: i32, %arg1: i32) -> (i32, i32) {
    %c0_i32 = arith.constant 0 : i32
    %c0_i32_0 = arith.constant 0 : i32
    %c0_i32_1 = arith.constant 0 : i32
    return %c0_i32, %c0_i32_0 : i32, i32
  }
  func.func @transform_4(%arg0: i32, %arg1: i32) -> (i32, i32) {
    %c0_i32 = arith.constant 0 : i32
    %c0_i32_0 = arith.constant 0 : i32
    %c0_i32_1 = arith.constant 0 : i32
    return %c0_i32, %c0_i32_0 : i32, i32
  }
  func.func @transform_5(%arg0: i32, %arg1: i32) -> (i32, i32) {
    %c1_i32 = arith.constant 1 : i32
    %0 = arith.muli %arg0, %c1_i32 : i32
    %1 = arith.addi %0, %arg1 : i32
    %c0_i32 = arith.constant 0 : i32
    %c0_i32_0 = arith.constant 0 : i32
    return %c0_i32, %1 : i32, i32
  }
}

</mosaic_0001>

<bundles_post_ra>
// kernel: _lambda_.1
= control target key start
LH: loop header
LB: loop body
LE: loop exit
PB: predicated region body
PF: predicated region fallthrough
CT: control target
= control target key end

     0   :  { %10 = vsyncpa [#allocation3], 0  ;;  %s647_s18 = smov 0   ;;  %s649_s19 = smov 0   ;;  %s730_s0 = inlined_call_operand.vmem [shape: f32[3,4], index: 0, kind: input, shape index: {}]   ;;  %s731_s1 = inlined_call_operand.vmem [shape: f32[4,8,128], index: 1, kind: input, shape index: {}]   ;;  %s732_s2 = inlined_call_operand.vmem [shape: f32[4,8,128], index: 2, kind: input, shape index: {}]   ;;  %s733_s3 = inlined_call_operand.vmem [shape: f32[8,8], index: 3, kind: input, shape index: {}]   ;;  %s734_s4 = inlined_call_operand.vmem [shape: f32[8,1], index: 4, kind: input, shape index: {}]   ;;  %s735_s5 = inlined_call_operand.vmem [shape: f32[1,512], index: 5, kind: output, shape index: {}]  }
   0x1   :  { %s651_s20 = smov 0  }
   0x2 LB: > { %s496_s21 = sadd.s32 4294967295, %s606_s20   ;;  %s28_s22 = sadd.s32 1, %s602_s19  ;;  %s606_s20 = sphi %s651_s20, %s16_s20   ;;  %s602_s19 = sphi %s649_s19, %s739_s19   ;;  %s598_s18 = sphi %s647_s18, %s738_s18  }
   0x3   : > { %p30_p0 = scmp.ge.s32.totalorder %s28_s22, 4  ;;  %p498_p1 = scmp.ge.s32.totalorder %s606_s20, 1 }
   0x4   : > { %p180_p2 = scmp.lt.s32.totalorder %s606_s20, 5  ;;  %p672_p4 = scmp.eq.s32.totalorder %s496_s21, 0 }
   0x5   : > { %s741_s22 = smov (%p30_p0, %s28_s22), 0  ;;  %s193_s27 = sshll.u32 %s730_s0, 4  ;;  %s194_s27 = int_to_ptr.vmem [resolvable:$true] %s193_s27 }
   0x6   : > { %p668_p3 = pnand %p498_p1, %p180_p2  ;;  %s565_s28 = scalar_lea.vmem %s194_s27, 64 }
   0x7   : > { %p566_p7 = scmp.ne.s32.totalorder %s194_s27, %s565_s28  ;;  %p573_p11 = scmp.lt.s32.totalorder %s194_s27, %s194_s27 }
   0x8   : > { %p517_p5 = pneg %p668_p3  ;;  %p574_p12 = scmp.lt.s32.totalorder %s565_s28, %s565_s28 }
   0xa   : > { %p518_p6 = pnand %p672_p4, %p517_p5  ;;  %p575_p13 = por %p574_p12, %p573_p11 }
   0xc   : > { %p567_p8 = pneg %p518_p6 }
   0xe   : > { %p568_p9 = pnand %p567_p8, %p566_p7 }
  0x10   : > { %p569_p10 = pneg %p568_p9 }
  0x12   : > { %p576_p0 = pnand %p575_p13, %p569_p10 }
  0x14   : > { %579 = shalt.err (!%p576_p0)
}
  0x15   : > { %s608_s29 = smov [#allocation2]   ;;  %232 = sbr.rel (%p668_p3) target bundleno = 206 (0xce), region = 40 }
  0x16   : > { %520 = dma.vmem_to_smem (!%p518_p6), %s194_s27, 64, %s608_s29, [#allocation3]  }
  0x1c   : > { %593 = dma.done.wait (%p672_p4), [#allocation3], 64  }
  0x1d   : > { %595 = vsyncadd (%p672_p4), [#allocation3], 4294967232 }
  0x1e   : > { %238 = sfence }
  0x1f   : > { %v308_v0 = vld [vmem:[%s733_s3] sm:$0xff]  ;;  %v609_v1 = vmov 2   ;;  %v610_v2 = vmov 0   ;;  %v611_v3 = vmov 3   ;;  %v612_v4 = vmov 1   ;;  %s289_s9 = sshra.s32 %s598_s18, 7 }
  0x20   : > { %558 = vset.pattern.permute.xlu1 %v609_v1  ;;  %556 = vset.pattern.permute.xlu0 %v610_v2  ;;  %v613_v5 = vmov 4   ;;  %v614_v6 = vmov 5   ;;  %v389_v7 = vld [vmem:[%s734_s4] sm:$0xff]  ;;  %v615_v8 = vmov 6   ;;  %v616_v9 = vmov 7   ;;  %s696_s10 = sshll.u32 %s289_s9, 7 }
  0x21   : > { %330 = vperm.xlu1 %558, %v308_v0   ;;  %311 = vperm.xlu0 %556, %v308_v0   ;;  %p269_p1 = scmp.lt.s32.totalorder %s598_s18, 3  ;;  %s510_s11 = sadd.s32 128, %s696_s10  ;;  %v314_v10 = vlaneseq }
  0x22   : > { %s294_s12 = sand.u32 127, %s598_s18  ;;  %s288_s15 = sld [smem:[#allocation2 + %s598_s18]] }
  0x23   : > { %s295_s13 = sadd.s32 %s510_s11, %s294_s12  ;;  %v315_v15 = vshrl.u32 %v314_v10, 7  ;;  %s512_s28 = sadd.s32 256, %s696_s10 }
  0x24   : > { %s704_s14 = scalar_select %p269_p1, %s598_s18, 3 }
  0x25   : > { %559 = vset.pattern.permute.xlu1 %v611_v3  ;;  %557 = vset.pattern.permute.xlu0 %v612_v4  ;;  %s296_s16 = sld [smem:[#allocation2 + %s295_s13]]  ;;  %v316_v18 = vsub.s32 0, %v315_v15  ;;  %v325_v19 = vsub.s32 1, %v315_v15  ;;  %v335_v20 = vsub.s32 2, %v315_v15  ;;  %v345_v25 = vsub.s32 3, %v315_v15  ;;  %s299_s29 = sadd.s32 %s512_s28, %s294_s12 }
  0x26   : > { %340 = vperm.xlu1 %559, %v308_v0   ;;  %320 = vperm.xlu0 %557, %v308_v0   ;;  %s503_s17 = sshll.u32 %s704_s14, 3  ;;  %v355_v27 = vsub.s32 4, %v315_v15  ;;  %v365_v31 = vsub.s32 5, %v315_v15  ;;  %v375_v39 = vsub.s32 6, %v315_v15  ;;  %v385_v48 = vsub.s32 7, %v315_v15  ;;  %s300_s30 = sld [smem:[#allocation2 + %s299_s29]] }
  0x27   : > { %s275_s24 = scalar_lea.vmem %s731_s1, %s503_s17  ;;  %s282_s27 = scalar_lea.vmem %s732_s2, %s503_s17 }
  0x28   : > { %v301_v11 = vld [vmem:[%s275_s24] sm:$0xff]  ;;  %v303_v13 = vstv %s288_s15  ;;  %s286_s8 = scalar_lea.vmem %s735_s5, %s704_s14 }
  0x29   : > { %v302_v12 = vld [vmem:[%s282_s27] sm:$0xff]  ;;  %v304_v16 = vmul.f32 %v303_v13, %v301_v11 }
  0x2a   : > { %560 = vset.pattern.permute.xlu1 %v613_v5  ;;  %561 = vset.pattern.permute.xlu0 %v614_v6 }
  0x2b   : > { %350 = vperm.xlu1 %560, %v308_v0   ;;  %360 = vperm.xlu0 %561, %v308_v0   ;;  %v305_v14 = vstv %s296_s16 }
  0x2c   : > { %v306_v17 = vmul.f32 %v305_v14, %v302_v12  ;;  %v404_v3 = vstv %s300_s30 }
  0x2e   : > { %v307_v22 = vadd.f32 %v306_v17, %v304_v16 }
  0x2f   : > { %562 = vset.pattern.permute.xlu1 %v615_v8  ;;  %564 = vset.pattern.permute.xlu0 %v610_v2 }
  0x30   : > { %370 = vperm.xlu1 %562, %v308_v0   ;;  %392 = vperm.xlu0 %564, %v389_v7   ;;  %v317_v24 = vrot.slane %v307_v22, %v316_v18  ;;  %v326_v26 = vrot.slane %v307_v22, %v325_v19  ;;  %v336_v28 = vrot.slane %v307_v22, %v335_v20 }
  0x31   : > { %v346_v33 = vrot.slane %v307_v22, %v345_v25  ;;  %v356_v35 = vrot.slane %v307_v22, %v355_v27  ;;  %v366_v38 = vrot.slane %v307_v22, %v365_v31  ;;  %v376_v47 = vrot.slane %v307_v22, %v375_v39 }
  0x32   : > { %v386_v53 = vrot.slane %v307_v22, %v385_v48 }
  0x34   : > { %563 = vset.pattern.permute.xlu1 %v616_v9 }
  0x35   : > { %380 = vperm.xlu1 %563, %v308_v0  }
  0xa0   : > { %v331_v21 = vpop.permute.xlu1 %330  ;;  %v312_v23 = vpop.permute.xlu0 %311 }
  0xa1   : > { %v318_v32 = vmul.f32 %v317_v24, %v312_v23  ;;  %v337_v36 = vmul.f32 %v336_v28, %v331_v21 }
  0xa5   : > { %v341_v29 = vpop.permute.xlu1 %340  ;;  %v321_v30 = vpop.permute.xlu0 %320 }
  0xa6   : > { %v327_v34 = vmul.f32 %v326_v26, %v321_v30  ;;  %v347_v40 = vmul.f32 %v346_v33, %v341_v29 }
  0xa8   : > { %v328_v37 = vadd.f32 %v327_v34, %v318_v32 }
  0xaa   : > { %v338_v41 = vadd.f32 %v337_v36, %v328_v37  ;;  %v351_v42 = vpop.permute.xlu1 %350  ;;  %v361_v43 = vpop.permute.xlu0 %360 }
  0xab   : > { %v357_v44 = vmul.f32 %v356_v35, %v351_v42  ;;  %v367_v46 = vmul.f32 %v366_v38, %v361_v43 }
  0xac   : > { %v348_v45 = vadd.f32 %v347_v40, %v338_v41 }
  0xae   : > { %v358_v49 = vadd.f32 %v357_v44, %v348_v45 }
  0xaf   : > { %v371_v50 = vpop.permute.xlu1 %370  ;;  %v393_v57 = vpop.permute.xlu0 %392 }
  0xb0   : > { %v368_v51 = vadd.f32 %v367_v46, %v358_v49  ;;  %v377_v52 = vmul.f32 %v376_v47, %v371_v50 }
  0xb2   : > { %v378_v55 = vadd.f32 %v377_v52, %v368_v51 }
  0xb4   : > { %v381_v54 = vpop.permute.xlu1 %380 }
  0xb5   : > { %v387_v56 = vmul.f32 %v386_v53, %v381_v54 }
  0xb7   : > { %v388_v58 = vadd.f32 %v387_v56, %v378_v55 }
  0xb9   : > { %v395_v59 = vadd.f32 %v393_v57, %v388_v58 }
  0xbb   : > { %v396_v60 = vsub.f32 %v395_v59, %v302_v12 }
  0xbd   : > { %v397_v61 = vand.u32 2147483647, %v396_v60 }
  0xbf   : > { %v398_v62 = vrot.slane %v397_v61, 4 }
  0xc1   : > { %v399_v63 = vadd.f32 %v398_v62, %v397_v61 }
  0xc3   : > { %v400_v0 = vrot.slane %v399_v63, 2 }
  0xc5   : > { %v401_v1 = vadd.f32 %v400_v0, %v399_v63 }
  0xc7   : > { %v402_v2 = vrot.slane %v401_v1, 1 }
  0xc9   : > { %v403_v4 = vadd.f32 %v402_v2, %v401_v1 }
  0xcb   : > { %v405_v5 = vmul.f32 %v404_v3, %v403_v4 }
  0xcd   : > { %406 = vst [vmem:[%s286_s8] sm:$0x1] %v405_v5 }
  0xce PF: > { %s16_s20 = sadd.s32 1, %s606_s20   ;;  %s738_s18 = smov %s602_s19 }
  0xcf   : > { %p13_p2 = scmp.ge.s32.totalorder %s16_s20, 6   ;;  %s739_s19 = smov %s741_s22 }
  0xd1   :  { %15 = sbr.rel (!%p13_p2) target bundleno = 2 (0x2), region = 78 }
  0xd8   :  { %427 = vsyncpa [#allocation3], 1 }
  0xd9   :  { %429 = vsyncpa [#allocation3 + $0x1], 1 }

</bundles_post_ra>
